<compile_context>
chip_gen: v6e
topology: v6e:2x2x1
jax: 0.10.0
libtpu: 0.0.40
codegen_flags: <defaults>
</compile_context>

<pallas_src>
import jax
import jax.numpy as jnp
from jax.experimental import pallas as pl
from jax.experimental.pallas import tpu as pltpu


# ----------------------------- kernels ---------------------------------------
def _mlp_stats(x_ref, w1_ref, b1_ref, w2_ref, b2_ref):
    """Linear(total_dim->H) + ReLU + Linear(H->2E); bf16 MXU ops, f32 accumulate.

    x arrives f32 and is cast to bf16 on the VPU in-kernel (no wrapper-side
    cast/pad copy of the activations in HBM).
    """
    x = x_ref[...].astype(jnp.bfloat16)
    h = jnp.dot(x, w1_ref[...], preferred_element_type=jnp.float32) + b1_ref[...]
    h = jnp.maximum(h, 0.0)
    stats = jnp.dot(h.astype(jnp.bfloat16), w2_ref[...],
                    preferred_element_type=jnp.float32) + b2_ref[...]
    return stats  # [bt, 2E] f32


def conditioning_sample_kernel(x_ref, w1_ref, b1_ref, w2_ref, b2_ref, eps_ref,
                               out_ref):
    """sample=True path.  out_ref: [bt, 3E] packed as [ z | mu | logvar ]."""
    stats = _mlp_stats(x_ref, w1_ref, b1_ref, w2_ref, b2_ref)       # [bt, 2E]
    E = eps_ref.shape[-1]
    mu = stats[:, :E]
    logvar = stats[:, E:]
    z = mu + eps_ref[...] * jnp.exp(0.5 * logvar)
    # Direct static sliced stores instead of an in-kernel concatenate.
    out_ref[:, :E] = z.astype(out_ref.dtype)
    out_ref[:, E:] = stats.astype(out_ref.dtype)


def conditioning_nosample_kernel(x_ref, w1_ref, b1_ref, w2_ref, b2_ref,
                                 out_ref):
    """sample=False path: no eps DMA, no exp/mul.  out_ref: [bt, 2E] = mu|logvar."""
    out_ref[...] = _mlp_stats(x_ref, w1_ref, b1_ref, w2_ref, b2_ref).astype(
        out_ref.dtype)


# ----------------------------- wrappers ---------------------------------------
def prepare_conditioning_params(w1, b1, w2, b2):
    """One-time weight prep (hoisted out of the per-call hot path).

    w1: [total_dim, H] (transposed vs. PyTorch nn.Linear.weight), b1: [H] or [1,H]
    w2: [H, 2E],                                                  b2: [2E] or [1,2E]
    Returns (w1_bf16, b1_f32[1,H], w2_bf16, b2_f32[1,2E]).
    """
    w1_b = jnp.asarray(w1, jnp.bfloat16)
    w2_b = jnp.asarray(w2, jnp.bfloat16)
    b1_2d = jnp.asarray(b1, jnp.float32).reshape(1, -1)
    b2_2d = jnp.asarray(b2, jnp.float32).reshape(1, -1)
    return (w1_b, b1_2d, w2_b, b2_2d)


def conditioning_forward(cat_embeddings, params, embedding_dim, *, eps=None,
                         sample=True, b_tile_max=4096, out_dtype=jnp.float32):
    """ConditioningModule.forward: concat embeddings -> MLP -> (z, mu, logvar).

    The nn.Embedding gather + torch.cat is plain-JAX glue; the fused kernel
    covers both Linear layers, the ReLU, the mu/logvar split and the
    reparameterization.  Returns (z, mu, logvar), each [B, E].
    """
    # TODO(synk): for very large batches the embedding gather+concat could also
    # be fused into the kernel via PrefetchScalarGridSpec (indices in SMEM).
    w1_b, b1_2d, w2_b, b2_2d = params
    E = int(embedding_dim)
    x = jnp.concatenate(cat_embeddings, axis=1)
    if x.dtype != jnp.float32:
        x = x.astype(jnp.float32)
    B, K = x.shape
    H = w1_b.shape[1]
    assert w1_b.shape == (K, H), "w1 must be [total_dim, H]"
    assert w2_b.shape == (H, 2 * E), "w2 must be [H, 2*embedding_dim]"

    # ---- batch tiling: few fat steps; >=2 "parallel" steps for large B so
    # v7x's two TensorCores both engage; pad bounded to <8 rows per step.
    want_split = B >= 512                       # irrelevant at small B
    n_steps = max(pl.cdiv(B, b_tile_max), 2 if want_split else 1)
    if n_steps == 1:
        b_tile = B                              # block == full dim: no (8,128) issue
    else:
        b_tile = ((pl.cdiv(B, n_steps) + 7) // 8) * 8
    Bp = n_steps * b_tile
    x_in = x if Bp == B else jnp.pad(x, ((0, Bp - B), (0, 0)))

    vmem = pltpu.MemorySpace.VMEM

    def batch_spec(cols):                       # batch-tiled operand / output
        return pl.BlockSpec((b_tile, cols), lambda i: (i, 0), memory_space=vmem)

    def resident_spec(shape):                   # constant index_map -> fetched once
        return pl.BlockSpec(shape, lambda i: (0, 0), memory_space=vmem)

    weight_args = (w1_b, b1_2d, w2_b, b2_2d)
    weight_specs = [resident_spec((K, H)), resident_spec((1, H)),
                    resident_spec((H, 2 * E)), resident_spec((1, 2 * E))]

    # Only raise the scoped-VMEM limit when a fat tile could actually bind
    # (v5e default is 16 MiB); tiny tiles keep the default for portability.
    out_cols = 3 * E if sample else 2 * E
    out_isz = jnp.dtype(out_dtype).itemsize
    est = 2 * b_tile * (K * 4 + (E * 4 if sample else 0) + out_cols * out_isz)
    est += 2 * (w1_b.size * 2 + w2_b.size * 2 + (b1_2d.size + b2_2d.size) * 4)
    vmem_limit = None
    if est > 12 * 1024 * 1024:
        vmem_limit = min(int(est * 1.5) + (2 << 20), 100 * 1024 * 1024)
    cparams = pltpu.CompilerParams(dimension_semantics=("parallel",),
                                   vmem_limit_bytes=vmem_limit)

    if sample:
        assert eps is not None and tuple(eps.shape) == (B, E), "eps must be [B, E]"
        eps_f = eps.astype(jnp.float32)
        eps_in = eps_f if Bp == B else jnp.pad(eps_f, ((0, Bp - B), (0, 0)))
        packed = pl.pallas_call(
            conditioning_sample_kernel,
            grid=(n_steps,),
            in_specs=[batch_spec(K)] + weight_specs + [batch_spec(E)],
            out_specs=batch_spec(3 * E),
            out_shape=jax.ShapeDtypeStruct((Bp, 3 * E), out_dtype),
            compiler_params=cparams,
        )(x_in, *weight_args, eps_in)
        z = packed[:B, :E]
        mu = packed[:B, E:2 * E]
        logvar = packed[:B, 2 * E:]
    else:
        packed = pl.pallas_call(
            conditioning_nosample_kernel,
            grid=(n_steps,),
            in_specs=[batch_spec(K)] + weight_specs,
            out_specs=batch_spec(2 * E),
            out_shape=jax.ShapeDtypeStruct((Bp, 2 * E), out_dtype),
            compiler_params=cparams,
        )(x_in, *weight_args)
        mu = packed[:B, :E]
        logvar = packed[:B, E:]
        z = mu                                   # z == mu when not sampling
    return z, mu, logvar


# ----------------------------- demo / check ----------------------------------
if __name__ == "__main__":
    key = jax.random.PRNGKey(0)

    categorical_dims = {"var_a": 5, "var_b": 7, "var_c": 3}
    embedding_dim = 16
    hidden = 128
    batch = 8
    total_dim = len(categorical_dims) * embedding_dim      # 48

    keys = jax.random.split(key, 16)

    # Synthetic parameters (shapes match nn.Embedding / nn.Linear)
    emb_tables = {}
    for i, (name, ncat) in enumerate(categorical_dims.items()):
        emb_tables[name] = jax.random.normal(keys[i], (ncat, embedding_dim),
                                             dtype=jnp.float32)

    w1 = jax.random.normal(keys[4], (total_dim, hidden), dtype=jnp.float32) * 0.1
    b1 = jax.random.normal(keys[5], (hidden,), dtype=jnp.float32) * 0.1
    w2 = jax.random.normal(keys[6], (hidden, 2 * embedding_dim),
                           dtype=jnp.float32) * 0.1
    b2 = jax.random.normal(keys[7], (2 * embedding_dim,), dtype=jnp.float32) * 0.1

    # One-time weight prep (hoisted out of the per-call hot path).
    params = prepare_conditioning_params(w1, b1, w2, b2)

    # Categorical lookups (glue, plain JAX — equivalent of nn.Embedding forward)
    cat_embeddings = []
    for i, (name, ncat) in enumerate(categorical_dims.items()):
        idx = jax.random.randint(keys[8 + i], (batch,), 0, ncat)
        cat_embeddings.append(jnp.take(emb_tables[name], idx, axis=0))   # [B, E]

    # Deterministic stand-in for torch.randn_like
    eps = jax.random.normal(keys[12], (batch, embedding_dim), dtype=jnp.float32)

    z, mu, logvar = conditioning_forward(cat_embeddings, params, embedding_dim,
                                         eps=eps, sample=True)
    z0, mu0, lv0 = conditioning_forward(cat_embeddings, params, embedding_dim,
                                        sample=False)
    jax.block_until_ready((z, mu, logvar, z0, mu0, lv0))

    # Pure-JAX reference under the same numerical contract as the kernel
    # (bf16 operands, f32 accumulation).
    x_full = jnp.concatenate(cat_embeddings, axis=1)
    h_ref = jnp.maximum(
        jnp.dot(x_full.astype(jnp.bfloat16), w1.astype(jnp.bfloat16),
                preferred_element_type=jnp.float32) + b1[None, :], 0.0)
    stats_ref = jnp.dot(h_ref.astype(jnp.bfloat16), w2.astype(jnp.bfloat16),
                        preferred_element_type=jnp.float32) + b2[None, :]
    mu_ref = stats_ref[:, :embedding_dim]
    lv_ref = stats_ref[:, embedding_dim:]
    z_ref = mu_ref + jnp.exp(0.5 * lv_ref) * eps

    assert jnp.allclose(mu, mu_ref, atol=2e-4), "mu mismatch"
    assert jnp.allclose(logvar, lv_ref, atol=2e-4), "logvar mismatch"
    assert jnp.allclose(z, z_ref, atol=2e-4), "z mismatch"
    assert jnp.allclose(mu0, mu_ref, atol=2e-4), "sample=False mu mismatch"
    assert jnp.allclose(lv0, lv_ref, atol=2e-4), "sample=False logvar mismatch"
    assert jnp.allclose(z0, mu0), "sample=False z must equal mu"

    # TODO(synk): fit_gmm / set_rare_threshold / score_samples use sklearn's
    # GaussianMixture (EM on host) and are not part of forward(); omitted.
    print("KERNEL_OK")
</pallas_src>

<mosaic_0001>
module attributes {stable_mosaic.version = 11 : i64} {
  func.func @conditioning_sample_kernel(%arg0: i32, %arg1: memref<8x48xf32, #tpu.memory_space<vmem>>, %arg2: memref<48x128xbf16, #tpu.memory_space<vmem>>, %arg3: memref<1x128xf32, #tpu.memory_space<vmem>>, %arg4: memref<128x32xbf16, #tpu.memory_space<vmem>>, %arg5: memref<1x32xf32, #tpu.memory_space<vmem>>, %arg6: memref<8x16xf32, #tpu.memory_space<vmem>>, %arg7: memref<8x48xf32, #tpu.memory_space<vmem>>) attributes {dimension_semantics = [#tpu.dimension_semantics<parallel>], iteration_bounds = array<i64: 1>, scalar_prefetch = 0 : i64, scratch_operands = 0 : i64, tpu.core_type = #tpu.core_type<tc>, window_params = [{transform_indices = @transform_0, window_bounds = array<i64: 8, 48>}, {pipeline_mode = #tpu.pipeline_mode<synchronous>, transform_indices = @transform_1, window_bounds = array<i64: 48, 128>}, {pipeline_mode = #tpu.pipeline_mode<synchronous>, transform_indices = @transform_2, window_bounds = array<i64: 1, 128>}, {pipeline_mode = #tpu.pipeline_mode<synchronous>, transform_indices = @transform_3, window_bounds = array<i64: 128, 32>}, {pipeline_mode = #tpu.pipeline_mode<synchronous>, transform_indices = @transform_4, window_bounds = array<i64: 1, 32>}, {transform_indices = @transform_5, window_bounds = array<i64: 8, 16>}, {transform_indices = @transform_6, window_bounds = array<i64: 8, 48>}]} {
    %c0 = arith.constant 0 : index
    %c0_0 = arith.constant 0 : index
    %0 = vector.load %arg1[%c0, %c0_0] : memref<8x48xf32, #tpu.memory_space<vmem>>, vector<8x48xf32>
    %1 = arith.truncf %0 : vector<8x48xf32> to vector<8x48xbf16>
    %c0_1 = arith.constant 0 : index
    %c0_2 = arith.constant 0 : index
    %2 = vector.load %arg2[%c0_1, %c0_2] : memref<48x128xbf16, #tpu.memory_space<vmem>>, vector<48x128xbf16>
    %cst = arith.constant dense<0.000000e+00> : vector<8x128xf32>
    %3 = tpu.matmul %1, %2, %cst {dimension_numbers = #tpu.dot_dimension_numbers<[1], [0], [0], [1], [0, 0, 1, 1], [], []>} : vector<8x48xbf16>, vector<48x128xbf16>, vector<8x128xf32> -> vector<8x128xf32>
    %c0_3 = arith.constant 0 : index
    %c0_4 = arith.constant 0 : index
    %4 = vector.load %arg3[%c0_3, %c0_4] : memref<1x128xf32, #tpu.memory_space<vmem>>, vector<1x128xf32>
    %5 = vector.broadcast %4 : vector<1x128xf32> to vector<8x128xf32>
    %6 = arith.addf %3, %5 : vector<8x128xf32>
    %cst_5 = arith.constant 0.000000e+00 : f32
    %7 = vector.broadcast %cst_5 : f32 to vector<8x128xf32>
    %8 = arith.maximumf %6, %7 : vector<8x128xf32>
    %9 = arith.truncf %8 : vector<8x128xf32> to vector<8x128xbf16>
    %c0_6 = arith.constant 0 : index
    %c0_7 = arith.constant 0 : index
    %10 = vector.load %arg4[%c0_6, %c0_7] : memref<128x32xbf16, #tpu.memory_space<vmem>>, vector<128x32xbf16>
    %cst_8 = arith.constant dense<0.000000e+00> : vector<8x32xf32>
    %11 = tpu.matmul %9, %10, %cst_8 {dimension_numbers = #tpu.dot_dimension_numbers<[1], [0], [0], [1], [0, 0, 1, 1], [], []>} : vector<8x128xbf16>, vector<128x32xbf16>, vector<8x32xf32> -> vector<8x32xf32>
    %c0_9 = arith.constant 0 : index
    %c0_10 = arith.constant 0 : index
    %12 = vector.load %arg5[%c0_9, %c0_10] : memref<1x32xf32, #tpu.memory_space<vmem>>, vector<1x32xf32>
    %13 = vector.broadcast %12 : vector<1x32xf32> to vector<8x32xf32>
    %14 = arith.addf %11, %13 : vector<8x32xf32>
    %15 = vector.extract_strided_slice %14 {offsets = [0, 0], sizes = [8, 16], strides = [1, 1]} : vector<8x32xf32> to vector<8x16xf32>
    %16 = vector.extract_strided_slice %14 {offsets = [0, 16], sizes = [8, 16], strides = [1, 1]} : vector<8x32xf32> to vector<8x16xf32>
    %c0_11 = arith.constant 0 : index
    %c0_12 = arith.constant 0 : index
    %17 = vector.load %arg6[%c0_11, %c0_12] : memref<8x16xf32, #tpu.memory_space<vmem>>, vector<8x16xf32>
    %cst_13 = arith.constant 5.000000e-01 : f32
    %18 = vector.broadcast %cst_13 : f32 to vector<8x16xf32>
    %19 = arith.mulf %18, %16 : vector<8x16xf32>
    %20 = math.exp %19 : vector<8x16xf32>
    %21 = arith.mulf %17, %20 : vector<8x16xf32>
    %22 = arith.addf %15, %21 : vector<8x16xf32>
    %c0_14 = arith.constant 0 : index
    %c0_15 = arith.constant 0 : index
    %23 = vector.load %arg7[%c0_14, %c0_15] : memref<8x48xf32, #tpu.memory_space<vmem>>, vector<8x16xf32>
    tpu.vector_store %arg7[%c0_14, %c0_15], %22 {strides = array<i32>} : memref<8x48xf32, #tpu.memory_space<vmem>>, vector<8x16xf32>,
    %c0_16 = arith.constant 0 : index
    %c16 = arith.constant 16 : index
    %24 = vector.load %arg7[%c0_16, %c16] : memref<8x48xf32, #tpu.memory_space<vmem>>, vector<8x32xf32>
    tpu.vector_store %arg7[%c0_16, %c16], %14 {strides = array<i32>} : memref<8x48xf32, #tpu.memory_space<vmem>>, vector<8x32xf32>,
    return
  }
  func.func @transform_0(%arg0: i32) -> (i32, i32) {
    %c0_i32 = arith.constant 0 : i32
    %c0_i32_0 = arith.constant 0 : i32
    return %arg0, %c0_i32 : i32, i32
  }
  func.func @transform_1(%arg0: i32) -> (i32, i32) {
    %c0_i32 = arith.constant 0 : i32
    %c0_i32_0 = arith.constant 0 : i32
    %c0_i32_1 = arith.constant 0 : i32
    return %c0_i32, %c0_i32_0 : i32, i32
  }
  func.func @transform_2(%arg0: i32) -> (i32, i32) {
    %c0_i32 = arith.constant 0 : i32
    %c0_i32_0 = arith.constant 0 : i32
    %c0_i32_1 = arith.constant 0 : i32
    return %c0_i32, %c0_i32_0 : i32, i32
  }
  func.func @transform_3(%arg0: i32) -> (i32, i32) {
    %c0_i32 = arith.constant 0 : i32
    %c0_i32_0 = arith.constant 0 : i32
    %c0_i32_1 = arith.constant 0 : i32
    return %c0_i32, %c0_i32_0 : i32, i32
  }
  func.func @transform_4(%arg0: i32) -> (i32, i32) {
    %c0_i32 = arith.constant 0 : i32
    %c0_i32_0 = arith.constant 0 : i32
    %c0_i32_1 = arith.constant 0 : i32
    return %c0_i32, %c0_i32_0 : i32, i32
  }
  func.func @transform_5(%arg0: i32) -> (i32, i32) {
    %c0_i32 = arith.constant 0 : i32
    %c0_i32_0 = arith.constant 0 : i32
    return %arg0, %c0_i32 : i32, i32
  }
  func.func @transform_6(%arg0: i32) -> (i32, i32) {
    %c0_i32 = arith.constant 0 : i32
    %c0_i32_0 = arith.constant 0 : i32
    return %arg0, %c0_i32 : i32, i32
  }
}

</mosaic_0001>

<bundles_post_ra>
// kernel: tpu_custom_call.1
= control target key start
LH: loop header
LB: loop body
LE: loop exit
PB: predicated region body
PF: predicated region fallthrough
CT: control target
= control target key end

     0   :  { %v344_v1 = vmov 0.0   ;;  %vm345_vm0 = vmmov 0   ;;  %vm58_vm1 = vcmask 392192   ;;  %s432_s0 = inlined_call_operand.vmem [shape: f32[8,48], index: 0, kind: input, shape index: {}]   ;;  %s433_s1 = inlined_call_operand.vmem [shape: bf16[48,128], index: 1, kind: input, shape index: {}]   ;;  %s434_s2 = inlined_call_operand.vmem [shape: f32[1,128], index: 2, kind: input, shape index: {}]   ;;  %s435_s3 = inlined_call_operand.vmem [shape: bf16[128,32], index: 3, kind: input, shape index: {}]   ;;  %s436_s4 = inlined_call_operand.vmem [shape: f32[1,32], index: 4, kind: input, shape index: {}]   ;;  %s437_s5 = inlined_call_operand.vmem [shape: f32[8,16], index: 5, kind: input, shape index: {}]   ;;  %s438_s6 = inlined_call_operand.hbm [shape: f32[8,48], index: 6, kind: output, shape index: {}]  }
   0x1   :  { %v309_v0 = vld [vmem:[%s433_s1 + $0x10] sm:$0xff]   ;;  %274 = vmatprep.subr.bf16.mxu0 %v344_v1  ;;  %284 = vmatprep.subr.bf16.mxu1 %v344_v1  ;;  %v310_v2 = vld [vmem:[%s433_s1 + $0x8] sm:$0xff]   ;;  %v311_v3 = vld [vmem:[%s433_s1] sm:$0xff]  }
   0x2   :  { %275 = vmatpush3.bf16.msra.mxu0 %v309_v0  ;;  %280 = vmatprep.mubr.msk.bf16.mxu0 %vm345_vm0, %v344_v1  ;;  %v312_v4 = vld [vmem:[%s435_s3 + $0x38] sm:$0xff]   ;;  %v25_v5 = vld [vmem:[%s432_s0] sm:$0xff]  ;;  %v313_v6 = vld [vmem:[%s435_s3 + $0x30] sm:$0xff]  }
   0x3   :  { %276 = vmatprep.subr.bf16.mxu0 %v344_v1  ;;  %300 = vmatprep.mubr.msk.bf16.mxu1 %vm345_vm0, %v344_v1  ;;  %v26_v7 = vpack.c.bf16 %v25_v5, %v25_v5  ;;  %v314_v8 = vld [vmem:[%s435_s3 + $0x28] sm:$0xff]  }
   0x4   :  { %285 = vmatpush3.bf16.msra.mxu1 %v312_v4 }
   0x5   :  { %286 = vmatprep.subr.bf16.mxu1 %v344_v1 }
   0x6   :  { %277 = vmatpush3.bf16.msra.mxu0 %v310_v2 }
   0x7   :  { %278 = vmatprep.subr.bf16.mxu0 %v344_v1 }
   0x8   :  { %287 = vmatpush3.bf16.msra.mxu1 %v313_v6 }
   0x9   :  { %288 = vmatprep.subr.bf16.mxu1 %v344_v1 }
   0xa   :  { %279 = vmatpush3.bf16.msra.mxu0 %v311_v3 }
   0xb   :  { %11 = vsyncpa [#allocation3], 0  ;;  %v315_v9 = vld [vmem:[%s435_s3 + $0x20] sm:$0xff]   ;;  %v316_v10 = vld [vmem:[%s435_s3 + $0x18] sm:$0xff]   ;;  %vm225_vm2 = vcmask 130048   ;;  %vm231_vm3 = vcmask 392320  }
   0xc   :  { %289 = vmatpush3.bf16.msra.mxu1 %v314_v8  ;;  %v317_v11 = vld [vmem:[%s435_s3 + $0x10] sm:$0xff]   ;;  %v318_v12 = vld [vmem:[%s435_s3 + $0x8] sm:$0xff]   ;;  %v319_v13 = vld [vmem:[%s435_s3] sm:$0xff]   ;;  %s347_s3 = smov 16  }
   0xd   :  { %281 = vmatmul.mubr.msk.bf16.vlgmr.msra.gmra.mxu0 %vm58_vm1, %v26_v7  ;;  %290 = vmatprep.subr.bf16.mxu1 %v344_v1  ;;  %v247_v14 = vld [vmem:[%s434_s2] ss:$0 sm:$0xff]  ;;  %s346_s2 = smov 112  }
   0xe   :  { %v252_v22 = vld [vmem:[%s436_s4] ss:$0 sm:$0xff]  ;;  %s348_s4 = smov [#allocation2]  }
   0xf   :  { %v215_v31 = vld [vmem:[%s437_s5] sm:$0xff]  ;;  %s239_s25 = sshll.u32 %s348_s4, 4  ;;  %s240_s25 = int_to_ptr.vmem [resolvable:$true] %s239_s25 }
  0x10   :  { %291 = vmatpush3.bf16.msra.mxu1 %v315_v9  ;;  %s322_s26 = scalar_lea.vmem %s240_s25, 128  ;;  %p327_p1 = scmp.lt.s32.totalorder %s240_s25, %s240_s25 }
  0x11   :  { %292 = vmatprep.subr.bf16.mxu1 %v344_v1  ;;  %p323_p0 = scmp.ne.s32.totalorder %s240_s25, %s322_s26  ;;  %p328_p2 = scmp.lt.s32.totalorder %s322_s26, %s322_s26 }
  0x13   :  { %p329_p3 = por %p328_p2, %p327_p1 }
  0x14   :  { %293 = vmatpush3.bf16.msra.mxu1 %v316_v10 }
  0x15   :  { %294 = vmatprep.subr.bf16.mxu1 %v344_v1  ;;  %p330_p4 = pnand %p329_p3, %p323_p0 }
  0x18   :  { %295 = vmatpush3.bf16.msra.mxu1 %v317_v11 }
  0x19   :  { %296 = vmatprep.subr.bf16.mxu1 %v344_v1 }
  0x1c   :  { %297 = vmatpush3.bf16.msra.mxu1 %v318_v12 }
  0x1d   :  { %298 = vmatprep.subr.bf16.mxu1 %v344_v1 }
  0x20   :  { %299 = vmatpush3.bf16.msra.mxu1 %v319_v13 }
  0xcd   :  { %v96_v15 = vpop.f32.mrf.mxu0 }
  0xce   :  { %v97_v16 = vadd.f32 %v247_v14, %v96_v15 }
  0xcf   :  { %v282_v17 = vpop.f32.mrf.mxu0 }
  0xd0   :  { %v102_v18 = vmax.f32 %v97_v16, 0.0 }
  0xd1   :  { %v99_v19 = vpop.f32.mrf.mxu0 }
  0xd2   :  { %v103_v20 = vpack.c.bf16 %v102_v18, %v102_v18 }
  0xd3   :  { %v283_v21 = vpop.f32.mrf.mxu0 }
  0xd4   :  { %301 = vmatmul.mubr.bf16.vlgmr.msra.gmra.mxu1 %v103_v20 }
 0x194   :  { %v209_v23 = vpop.f32.mrf.mxu1 }
 0x195   :  { %v210_v24 = vadd.f32 %v252_v22, %v209_v23 }
 0x196   :  { %v302_v25 = vpop.f32.mrf.mxu1 }
 0x197   :  { %v216_v26 = vmul.f32 0.5, %v210_v24 }
 0x198   :  { %v212_v27 = vpop.f32.mrf.mxu1 }
 0x199   :  { %v217_v28 = vmul.f32 1.442695, %v216_v26 }
 0x19a   :  { %v303_v29 = vpop.f32.mrf.mxu1 }
 0x19b   :  { %320 = vpow2.f32 %v217_v28 }
 0x1a8   :  { %v321_v30 = vpop.eup %320 }
 0x1a9   :  { %220 = vrot.lane.b32.xlu0 %v321_v30, %s346_s2 }
 0x1ad   :  { %228 = vrot.lane.b32.xlu0 %v210_v24, %s347_s3 }
 0x21b   :  { %v221_v32 = vpop.permute.xlu0 %220 }
 0x21c   :  { %v223_v33 = vmul.f32 %v221_v32, %v215_v31 }
 0x21e   :  { %v224_v34 = vadd.f32 %v223_v33, %v210_v24 }
 0x21f   :  { %v229_v35 = vpop.permute.xlu0 %228 }
 0x220   :  { %226 = vst.msk [vmem:[#allocation2] sm:$0xff] %vm225_vm2, %v224_v34 }
 0x221   :  { %232 = vst.msk [vmem:[#allocation2] sm:$0xff] %vm231_vm3, %v229_v35 }
 0x222   :  { %333 = shalt.err (!%p330_p4)
}
 0x223   :  { %242 = dma.vmem_to_hbm [thread:$0]  %s240_s25, 128, %s438_s6, [#allocation3]  }
 0x224   :  { %342 = dma.done.wait [#allocation3], 128  }
 0x225   :  { %343 = vsyncadd [#allocation3], 4294967168 }
 0x226   :  { %246 = vsyncpa [#allocation3], 1 }

</bundles_post_ra>
